<compile_context>
chip_gen: v6e
topology: v6e:2x2x1
jax: 0.10.0
libtpu: 0.0.40
codegen_flags: <defaults>
</compile_context>

<pallas_src>
import numpy as np
import jax
import jax.numpy as jnp
from jax.experimental import pallas as pl
from jax.experimental.pallas import tpu as pltpu


def _equimatch_kernel(d1_ref, d2_ref, sel_ref, o_ref):
    """One batch tile of EquiMatch.

    d1_ref : (TB, CK, L)  descriptor 1, native dtype, contraction dim CK
    d2_ref : (TB, CK, L)  descriptor 2, native dtype
    sel_ref: (L*L, L)     wrapped-diagonal selector (f32), VMEM-resident
    o_ref  : (TB, L)      correlation for every azimuth shift a in [0, L)
    """
    tb, L = o_ref.shape

    # 1) Gram matrix on the MXU: g[b, i, j] = sum_c d1[b, c, i] * d2[b, c, j].
    #    Transposed-LHS batched contraction; Mosaic handles the operand layout
    #    in VMEM, so the wrapper never transposes des1 in HBM.
    g = jax.lax.dot_general(
        d1_ref[...], d2_ref[...],
        dimension_numbers=(((1,), (1,)), ((0,), (0,))),
        preferred_element_type=jnp.float32)            # (TB, L, L), f32 acc

    # 2) Wrapped-diagonal reduction as a second (tiny) MXU matmul:
    #    cor[b, a] = sum_{i,j} g[b, i, j] * sel[i*L + j, a]
    #              = sum_i    g[b, i, (i + a) % L].
    cor = jnp.dot(g.reshape(tb, L * L), sel_ref[...],
                  preferred_element_type=jnp.float32)  # (TB, L)
    o_ref[...] = cor.astype(o_ref.dtype)


def _round_up(x, m):
    return (x + m - 1) // m * m


def _tpu_target():
    """Chip-dependent tiling knobs: #TCs sharing the grid, VMEM budget/limit."""
    kind = ""
    try:
        dev = jax.devices()[0]
        if dev.platform == "tpu":
            kind = dev.device_kind.lower()
    except Exception:
        pass
    if "7" in kind:                         # v7x: 2 TCs/chip, 64 MiB VMEM per TC
        return {"num_tcs": 2, "vmem_budget": 20 << 20, "vmem_limit": 48 << 20}
    if ("v4" in kind) or ("v5p" in kind):   # megacore: 2 TCs share the grid
        return {"num_tcs": 2, "vmem_budget": 48 << 20, "vmem_limit": 96 << 20}
    if kind:                                # v5e / v6e: single TC, 128 MiB VMEM
        return {"num_tcs": 1, "vmem_budget": 48 << 20, "vmem_limit": 96 << 20}
    return {"num_tcs": 1, "vmem_budget": 20 << 20, "vmem_limit": 48 << 20}


def _choose_tb(B, CK, L, in_itemsize, vmem_budget, num_tcs):
    """Batch tile sized against the *real* VMEM footprint: (sublane, lane)
    padding of every block, x2 double buffering per pipelined operand, plus the
    in-kernel f32 intermediates (Gram tensor and its flattened copy)."""
    if B <= 8:
        return B                                       # single full-batch block

    lane = 128
    sub_in = max(8, (8 * 4) // in_itemsize)            # sublane tile of input dtype
    Lp = _round_up(L, lane)
    L2p = _round_up(L * L, lane)
    CKp = _round_up(CK, sub_in)
    Lsub = _round_up(L, 8)

    def footprint(tb):
        inputs = 2 * 2 * tb * CKp * Lp * in_itemsize   # 2 operands, 2 buffers each
        sel = 2 * _round_up(L * L, 8) * Lp * 4         # VMEM-resident selector
        out = 2 * _round_up(tb, 8) * Lp * 4
        g = tb * Lsub * Lp * 4                         # (TB, L, L) f32
        g_flat = _round_up(tb, 8) * L2p * 4            # (TB, L*L) f32
        return inputs + sel + out + g + g_flat

    b8 = _round_up(B, 8)
    tb = max(8, (min(b8, 1024) // 8) * 8)
    while tb > 8 and footprint(tb) > vmem_budget:
        tb -= 8

    # Multi-TC chips: the batch grid axis is "parallel"; keep >= num_tcs steps.
    # Single-TC chips keep the largest tile (more steps only add per-step
    # overhead on a serial grid).
    if num_tcs > 1 and b8 >= 8 * num_tcs:
        tb = min(tb, max(8, (b8 // num_tcs // 8) * 8))

    # Prefer a tile that divides B exactly (no ragged final block) when one is
    # available without shrinking the tile by more than 2x.
    if B % 8 == 0 and B % tb != 0:
        for cand in range(tb - 8, 7, -8):
            if B % cand == 0:
                if 2 * cand >= tb:
                    tb = cand
                break
    return tb


def _selector(L):
    """(L*L, L) one-hot matrix: sel[i*L + j, a] = 1 iff j == (i + a) % L."""
    sel = np.zeros((L, L, L), dtype=np.float32)
    idx = np.arange(L)
    for a in range(L):
        sel[idx, (idx + a) % L, a] = 1.0
    return jnp.asarray(sel.reshape(L * L, L))


def equi_match(des1, des2, azi_n):
    """Pallas implementation of EquiMatch.forward. Returns (B, azi_n) f32."""
    B, C, K, L = des1.shape
    assert L == azi_n
    CK = C * K

    # Metadata-only reshapes (no extra HBM pass); descriptors stay in native
    # dtype and (B, CK, L) layout, the transposed contraction happens in-kernel.
    d1 = des1.reshape(B, CK, L)
    d2 = des2.reshape(B, CK, L)
    sel = _selector(L)
    # TODO(synk): for very large azi_n (L^3 selector >> VMEM budget) chunk the
    # selector over the shift axis instead of keeping it fully VMEM-resident.

    tgt = _tpu_target()
    itemsize = np.dtype(des1.dtype).itemsize
    TB = _choose_tb(B, CK, L, itemsize, tgt["vmem_budget"], tgt["num_tcs"])
    grid = (pl.cdiv(B, TB),)   # no input padding: ragged last block is masked

    flops = 2 * B * CK * L * L + 2 * B * L * L * L
    bytes_accessed = 2 * B * CK * L * itemsize + L * L * L * 4 + B * L * 4

    return pl.pallas_call(
        _equimatch_kernel,
        out_shape=jax.ShapeDtypeStruct((B, L), jnp.float32),
        grid_spec=pltpu.PrefetchScalarGridSpec(
            num_scalar_prefetch=0,
            grid=grid,
            in_specs=[
                pl.BlockSpec((TB, CK, L), lambda b: (b, 0, 0)),
                pl.BlockSpec((TB, CK, L), lambda b: (b, 0, 0)),
                # Constant block index -> DMA'd once, stays VMEM-resident.
                pl.BlockSpec((L * L, L), lambda b: (0, 0)),
            ],
            out_specs=pl.BlockSpec((TB, L), lambda b: (b, 0)),
        ),
        compiler_params=pltpu.CompilerParams(
            dimension_semantics=("parallel",),
            vmem_limit_bytes=tgt["vmem_limit"],
        ),
        cost_estimate=pl.CostEstimate(
            flops=flops, transcendentals=0, bytes_accessed=bytes_accessed),
    )(d1, d2, sel)


def equi_match_reference(des1, des2, azi_n):
    """Pure-JAX transcription of the PyTorch forward (for verification)."""
    B, C, K, L = des1.shape
    init_index = np.arange(azi_n)
    index_list = np.array(
        [np.concatenate([init_index[azi_n - i:], init_index[:azi_n - i]])
         for i in range(azi_n)])                              # (L, L)
    d1 = des1[:, :, :, index_list.reshape(-1)]                # (B, C, K, L*L)
    d1 = d1.reshape(B, C, K, azi_n, azi_n)                    # b c k n l
    d1 = jnp.transpose(d1, (0, 1, 3, 2, 4)).reshape(B, C, azi_n, K * L)
    d2 = des2.reshape(B, C, K * L)
    return jnp.einsum('bfag,bfg->ba', d1, d2)


if __name__ == "__main__":
    B, C, K, azi_n = 16, 4, 16, 8
    key = jax.random.PRNGKey(0)
    k1, k2 = jax.random.split(key)
    des1 = jax.random.normal(k1, (B, C, K, azi_n), dtype=jnp.float32)
    des2 = jax.random.normal(k2, (B, C, K, azi_n), dtype=jnp.float32)

    cor = jax.block_until_ready(equi_match(des1, des2, azi_n))

    ref = equi_match_reference(des1, des2, azi_n)
    assert cor.shape == (B, azi_n), cor.shape
    if not jnp.allclose(cor, ref, atol=1e-3, rtol=1e-3):
        raise AssertionError(
            f"mismatch: max abs err = {jnp.max(jnp.abs(cor - ref))}")
    print("KERNEL_OK")
</pallas_src>

<mosaic_0001>
module attributes {stable_mosaic.version = 11 : i64} {
  func.func @_equimatch_kernel(%arg0: i32, %arg1: memref<16x64x8xf32, #tpu.memory_space<vmem>>, %arg2: memref<16x64x8xf32, #tpu.memory_space<vmem>>, %arg3: memref<64x8xf32, #tpu.memory_space<vmem>>, %arg4: memref<16x8xf32, #tpu.memory_space<vmem>>) attributes {dimension_semantics = [#tpu.dimension_semantics<parallel>], iteration_bounds = array<i64: 1>, scalar_prefetch = 0 : i64, scratch_operands = 0 : i64, tpu.core_type = #tpu.core_type<tc>, window_params = [{transform_indices = @transform_0, window_bounds = array<i64: 16, 64, 8>}, {transform_indices = @transform_1, window_bounds = array<i64: 16, 64, 8>}, {pipeline_mode = #tpu.pipeline_mode<synchronous>, transform_indices = @transform_2, window_bounds = array<i64: 64, 8>}, {transform_indices = @transform_3, window_bounds = array<i64: 16, 8>}]} {
    %c0 = arith.constant 0 : index
    %c0_0 = arith.constant 0 : index
    %c0_1 = arith.constant 0 : index
    %0 = vector.load %arg1[%c0, %c0_0, %c0_1] : memref<16x64x8xf32, #tpu.memory_space<vmem>>, vector<16x64x8xf32>
    %c0_2 = arith.constant 0 : index
    %c0_3 = arith.constant 0 : index
    %c0_4 = arith.constant 0 : index
    %1 = vector.load %arg2[%c0_2, %c0_3, %c0_4] : memref<16x64x8xf32, #tpu.memory_space<vmem>>, vector<16x64x8xf32>
    %cst = arith.constant dense<0.000000e+00> : vector<16x8x8xf32>
    %2 = tpu.matmul %0, %1, %cst {dimension_numbers = #tpu.dot_dimension_numbers<[1], [1], [2], [2], [0, 0, 0, 2, 1, 2], [0], [0]>} : vector<16x64x8xf32>, vector<16x64x8xf32>, vector<16x8x8xf32> -> vector<16x8x8xf32>
    %3 = vector.shape_cast %2 : vector<16x8x8xf32> to vector<16x64xf32>
    %c0_5 = arith.constant 0 : index
    %c0_6 = arith.constant 0 : index
    %4 = vector.load %arg3[%c0_5, %c0_6] : memref<64x8xf32, #tpu.memory_space<vmem>>, vector<64x8xf32>
    %cst_7 = arith.constant dense<0.000000e+00> : vector<16x8xf32>
    %5 = tpu.matmul %3, %4, %cst_7 {dimension_numbers = #tpu.dot_dimension_numbers<[1], [0], [0], [1], [0, 0, 1, 1], [], []>} : vector<16x64xf32>, vector<64x8xf32>, vector<16x8xf32> -> vector<16x8xf32>
    %c0_8 = arith.constant 0 : index
    %c0_9 = arith.constant 0 : index
    %6 = vector.load %arg4[%c0_8, %c0_9] : memref<16x8xf32, #tpu.memory_space<vmem>>, vector<16x8xf32>
    tpu.vector_store %arg4[%c0_8, %c0_9], %5 {strides = array<i32>} : memref<16x8xf32, #tpu.memory_space<vmem>>, vector<16x8xf32>,
    return
  }
  func.func @transform_0(%arg0: i32) -> (i32, i32, i32) {
    %c0_i32 = arith.constant 0 : i32
    %c0_i32_0 = arith.constant 0 : i32
    %c0_i32_1 = arith.constant 0 : i32
    return %arg0, %c0_i32, %c0_i32_0 : i32, i32, i32
  }
  func.func @transform_1(%arg0: i32) -> (i32, i32, i32) {
    %c0_i32 = arith.constant 0 : i32
    %c0_i32_0 = arith.constant 0 : i32
    %c0_i32_1 = arith.constant 0 : i32
    return %arg0, %c0_i32, %c0_i32_0 : i32, i32, i32
  }
  func.func @transform_2(%arg0: i32) -> (i32, i32) {
    %c0_i32 = arith.constant 0 : i32
    %c0_i32_0 = arith.constant 0 : i32
    %c0_i32_1 = arith.constant 0 : i32
    return %c0_i32, %c0_i32_0 : i32, i32
  }
  func.func @transform_3(%arg0: i32) -> (i32, i32) {
    %c0_i32 = arith.constant 0 : i32
    %c0_i32_0 = arith.constant 0 : i32
    return %arg0, %c0_i32 : i32, i32
  }
}

</mosaic_0001>

<bundles_post_ra>
// kernel: tpu_custom_call.1
= control target key start
LH: loop header
LB: loop body
LE: loop exit
PB: predicated region body
PF: predicated region fallthrough
CT: control target
= control target key end

     0   :  { %v2901_v18 = vmov 0.0   ;;  %vm2902_vm0 = vmmov 0   ;;  %vm302_vm1 = vcmask 523264   ;;  %s2906_s7 = smov 8   ;;  %s2907_s8 = smov 24   ;;  %vm2279_vm2 = vcmask 64512   ;;  %s4007_s0 = inlined_call_operand.vmem [shape: f32[16,64,8], index: 0, kind: input, shape index: {}]   ;;  %s4008_s1 = inlined_call_operand.vmem [shape: f32[16,64,8], index: 1, kind: input, shape index: {}]   ;;  %s4009_s2 = inlined_call_operand.vmem [shape: f32[64,8], index: 2, kind: input, shape index: {}]   ;;  %s4010_s3 = inlined_call_operand.vmem [shape: f32[16,8], index: 3, kind: output, shape index: {}]  }
   0x1   :  { %v22_v0 = vld [vmem:[%s4007_s0 + $0x40] sm:$0xff]  ;;  %v23_v2 = vld [vmem:[%s4007_s0 + $0x48] sm:$0xff]  ;;  %v24_v4 = vld [vmem:[%s4007_s0 + $0x50] sm:$0xff]  ;;  %2567 = vmatprep.subr.mxu0 %v2901_v18  ;;  %2586 = vmatprep.subr.mxu1 %v2901_v18  ;;  %s2908_s9 = smov 32   ;;  %s2909_s10 = smov 40   ;;  %vm2282_vm3 = vcmask 130048  }
   0x2   :  { %v14_v1 = vld [vmem:[%s4007_s0] sm:$0xff]  ;;  %376 = vxpose.xlu1.b32.start [1/8] (short) (narrow) %v22_v0, 8  ;;  %v15_v3 = vld [vmem:[%s4007_s0 + $0x8] sm:$0xff]  ;;  %v16_v5 = vld [vmem:[%s4007_s0 + $0x10] sm:$0xff]  ;;  %2583 = vmatprep.mubr.msk.f32.mxu0 %vm2902_vm0, %v2901_v18  ;;  %s2910_s11 = smov 48   ;;  %s2911_s28 = smov 56  }
   0x3   :  { %270 = vxpose.xlu0.b32.start [1/8] (short) (narrow) %v14_v1, 8  ;;  %v25_v6 = vld [vmem:[%s4007_s0 + $0x58] sm:$0xff]  ;;  %v26_v8 = vld [vmem:[%s4007_s0 + $0x60] sm:$0xff]  ;;  %v27_v10 = vld [vmem:[%s4007_s0 + $0x68] sm:$0xff]  ;;  %2602 = vmatprep.mubr.msk.f32.mxu1 %vm2902_vm0, %v2901_v18  ;;  %vm2285_vm4 = vcmask 195584   ;;  %vm2288_vm5 = vcmask 261120  }
   0x4   :  { %v17_v7 = vld [vmem:[%s4007_s0 + $0x18] sm:$0xff]  ;;  %v18_v9 = vld [vmem:[%s4007_s0 + $0x20] sm:$0xff]  ;;  %v19_v11 = vld [vmem:[%s4007_s0 + $0x28] sm:$0xff]  ;;  %vm2291_vm6 = vcmask 326656   ;;  %vm2294_vm7 = vcmask 392192   ;;  %vm2297_vm8 = vcmask 457728  }
   0x5   :  { %v28_v12 = vld [vmem:[%s4007_s0 + $0x70] sm:$0xff]  ;;  %v29_v14 = vld [vmem:[%s4007_s0 + $0x78] sm:$0xff]  ;;  %v38_v16 = vld [vmem:[%s4007_s0 + $0xc0] sm:$0xff] }
   0x6   :  { %377 = vxpose.xlu1.b32.cont [2/8] (short) (narrow) %v23_v2, 8  ;;  %v20_v13 = vld [vmem:[%s4007_s0 + $0x30] sm:$0xff]  ;;  %v21_v15 = vld [vmem:[%s4007_s0 + $0x38] sm:$0xff]  ;;  %v30_v17 = vld [vmem:[%s4007_s0 + $0x80] sm:$0xff] }
   0x7   :  { %271 = vxpose.xlu0.b32.cont [2/8] (short) (narrow) %v15_v3, 8  ;;  %v149_v19 = vld [vmem:[%s4008_s1 + $0x38] sm:$0xff]  ;;  %v148_v21 = vld [vmem:[%s4008_s1 + $0x30] sm:$0xff]  ;;  %v147_v23 = vld [vmem:[%s4008_s1 + $0x28] sm:$0xff] }
   0x8   :  { %v157_v20 = vld [vmem:[%s4008_s1 + $0x78] sm:$0xff]  ;;  %2568 = vmatpush3.msra.mxu0 %v149_v19  ;;  %v156_v22 = vld [vmem:[%s4008_s1 + $0x70] sm:$0xff]  ;;  %v155_v24 = vld [vmem:[%s4008_s1 + $0x68] sm:$0xff] }
   0x9   :  { %2587 = vmatpush3.msra.mxu1 %v157_v20  ;;  %2569 = vmatprep.subr.mxu0 %v2901_v18  ;;  %v39_v25 = vld [vmem:[%s4007_s0 + $0xc8] sm:$0xff]  ;;  %v146_v27 = vld [vmem:[%s4008_s1 + $0x20] sm:$0xff]  ;;  %v40_v29 = vld [vmem:[%s4007_s0 + $0xd0] sm:$0xff] }
   0xa   :  { %378 = vxpose.xlu1.b32.cont [3/8] (short) (narrow) %v24_v4, 8  ;;  %2588 = vmatprep.subr.mxu1 %v2901_v18  ;;  %v31_v26 = vld [vmem:[%s4007_s0 + $0x88] sm:$0xff]  ;;  %v154_v28 = vld [vmem:[%s4008_s1 + $0x60] sm:$0xff]  ;;  %v32_v30 = vld [vmem:[%s4007_s0 + $0x90] sm:$0xff] }
   0xb   :  { %272 = vxpose.xlu0.b32.cont [3/8] (short) (narrow) %v16_v5, 8  ;;  %2570 = vmatpush3.msra.mxu0 %v148_v21  ;;  %v145_v31 = vld [vmem:[%s4008_s1 + $0x18] sm:$0xff]  ;;  %v144_v33 = vld [vmem:[%s4008_s1 + $0x10] sm:$0xff]  ;;  %v143_v37 = vld [vmem:[%s4008_s1 + $0x8] sm:$0xff] }
   0xc   :  { %2589 = vmatpush3.msra.mxu1 %v156_v22  ;;  %2571 = vmatprep.subr.mxu0 %v2901_v18  ;;  %v153_v32 = vld [vmem:[%s4008_s1 + $0x58] sm:$0xff]  ;;  %v152_v34 = vld [vmem:[%s4008_s1 + $0x50] sm:$0xff]  ;;  %v151_v38 = vld [vmem:[%s4008_s1 + $0x48] sm:$0xff] }
   0xd   :  { %2590 = vmatprep.subr.mxu1 %v2901_v18  ;;  %2572 = vmatpush3.msra.mxu0 %v147_v23  ;;  %v41_v35 = vld [vmem:[%s4007_s0 + $0xd8] sm:$0xff]  ;;  %v42_v39 = vld [vmem:[%s4007_s0 + $0xe0] sm:$0xff]  ;;  %v43_v43 = vld [vmem:[%s4007_s0 + $0xe8] sm:$0xff] }
   0xe   :  { %379 = vxpose.xlu1.b32.cont [4/8] (short) (narrow) %v25_v6, 8  ;;  %2591 = vmatpush3.msra.mxu1 %v155_v24  ;;  %v33_v36 = vld [vmem:[%s4007_s0 + $0x98] sm:$0xff]  ;;  %v34_v40 = vld [vmem:[%s4007_s0 + $0xa0] sm:$0xff]  ;;  %v35_v44 = vld [vmem:[%s4007_s0 + $0xa8] sm:$0xff] }
   0xf   :  { %273 = vxpose.xlu0.b32.cont [4/8] (short) (narrow) %v17_v7, 8  ;;  %2573 = vmatprep.subr.mxu0 %v2901_v18  ;;  %v142_v41 = vld [vmem:[%s4008_s1] sm:$0xff]  ;;  %v44_v45 = vld [vmem:[%s4007_s0 + $0xf0] sm:$0xff]  ;;  %v45_v47 = vld [vmem:[%s4007_s0 + $0xf8] sm:$0xff] }
  0x10   :  { %2592 = vmatprep.subr.mxu1 %v2901_v18  ;;  %2574 = vmatpush3.msra.mxu0 %v146_v27  ;;  %v150_v42 = vld [vmem:[%s4008_s1 + $0x40] sm:$0xff]  ;;  %v36_v46 = vld [vmem:[%s4007_s0 + $0xb0] sm:$0xff]  ;;  %v37_v48 = vld [vmem:[%s4007_s0 + $0xb8] sm:$0xff] }
  0x11   :  { %2593 = vmatpush3.msra.mxu1 %v154_v28  ;;  %2575 = vmatprep.subr.mxu0 %v2901_v18  ;;  %v54_v49 = vld [vmem:[%s4007_s0 + $0x140] sm:$0xff]  ;;  %v55_v51 = vld [vmem:[%s4007_s0 + $0x148] sm:$0xff]  ;;  %v56_v53 = vld [vmem:[%s4007_s0 + $0x150] sm:$0xff] }
  0x12   :  { %380 = vxpose.xlu1.b32.cont [5/8] (short) (narrow) %v26_v8, 8  ;;  %2594 = vmatprep.subr.mxu1 %v2901_v18  ;;  %v46_v50 = vld [vmem:[%s4007_s0 + $0x100] sm:$0xff]  ;;  %v47_v52 = vld [vmem:[%s4007_s0 + $0x108] sm:$0xff]  ;;  %v48_v54 = vld [vmem:[%s4007_s0 + $0x110] sm:$0xff] }
  0x13   :  { %274 = vxpose.xlu0.b32.cont [5/8] (short) (narrow) %v18_v9, 8  ;;  %2576 = vmatpush3.msra.mxu0 %v145_v31  ;;  %v57_v55 = vld [vmem:[%s4007_s0 + $0x158] sm:$0xff]  ;;  %v58_v57 = vld [vmem:[%s4007_s0 + $0x160] sm:$0xff]  ;;  %v59_v59 = vld [vmem:[%s4007_s0 + $0x168] sm:$0xff] }
  0x14   :  { %2595 = vmatpush3.msra.mxu1 %v153_v32  ;;  %2577 = vmatprep.subr.mxu0 %v2901_v18  ;;  %v49_v56 = vld [vmem:[%s4007_s0 + $0x118] sm:$0xff]  ;;  %v50_v58 = vld [vmem:[%s4007_s0 + $0x120] sm:$0xff]  ;;  %v51_v60 = vld [vmem:[%s4007_s0 + $0x128] sm:$0xff] }
  0x15   :  { %2596 = vmatprep.subr.mxu1 %v2901_v18  ;;  %2578 = vmatpush3.msra.mxu0 %v144_v33  ;;  %v60_v61 = vld [vmem:[%s4007_s0 + $0x170] sm:$0xff]  ;;  %v61_v63 = vld [vmem:[%s4007_s0 + $0x178] sm:$0xff]  ;;  %v70_v1 = vld [vmem:[%s4007_s0 + $0x1c0] sm:$0xff] }
  0x16   :  { %381 = vxpose.xlu1.b32.cont [6/8] (short) (narrow) %v27_v10, 8  ;;  %2597 = vmatpush3.msra.mxu1 %v152_v34  ;;  %v52_v62 = vld [vmem:[%s4007_s0 + $0x130] sm:$0xff]  ;;  %v53_v0 = vld [vmem:[%s4007_s0 + $0x138] sm:$0xff]  ;;  %v62_v2 = vld [vmem:[%s4007_s0 + $0x180] sm:$0xff] }
  0x17   :  { %275 = vxpose.xlu0.b32.cont [6/8] (short) (narrow) %v19_v11, 8  ;;  %2579 = vmatprep.subr.mxu0 %v2901_v18  ;;  %v71_v3 = vld [vmem:[%s4007_s0 + $0x1c8] sm:$0xff]  ;;  %v72_v5 = vld [vmem:[%s4007_s0 + $0x1d0] sm:$0xff]  ;;  %v73_v7 = vld [vmem:[%s4007_s0 + $0x1d8] sm:$0xff] }
  0x18   :  { %2598 = vmatprep.subr.mxu1 %v2901_v18  ;;  %2580 = vmatpush3.msra.mxu0 %v143_v37  ;;  %v63_v4 = vld [vmem:[%s4007_s0 + $0x188] sm:$0xff]  ;;  %v64_v6 = vld [vmem:[%s4007_s0 + $0x190] sm:$0xff]  ;;  %v65_v8 = vld [vmem:[%s4007_s0 + $0x198] sm:$0xff] }
  0x19   :  { %2599 = vmatpush3.msra.mxu1 %v151_v38  ;;  %2581 = vmatprep.subr.mxu0 %v2901_v18  ;;  %v74_v9 = vld [vmem:[%s4007_s0 + $0x1e0] sm:$0xff]  ;;  %v75_v11 = vld [vmem:[%s4007_s0 + $0x1e8] sm:$0xff]  ;;  %v173_v19 = vld [vmem:[%s4008_s1 + $0xf8] sm:$0xff] }
  0x1a   :  { %382 = vxpose.xlu1.b32.cont [7/8] (short) (narrow) %v28_v12, 8  ;;  %2600 = vmatprep.subr.mxu1 %v2901_v18  ;;  %v66_v10 = vld [vmem:[%s4007_s0 + $0x1a0] sm:$0xff]  ;;  %v67_v12 = vld [vmem:[%s4007_s0 + $0x1a8] sm:$0xff]  ;;  %v172_v24 = vld [vmem:[%s4008_s1 + $0xf0] sm:$0xff] }
  0x1b   :  { %276 = vxpose.xlu0.b32.cont [7/8] (short) (narrow) %v20_v13, 8  ;;  %2582 = vmatpush3.msra.mxu0 %v142_v41  ;;  %v76_v13 = vld [vmem:[%s4007_s0 + $0x1f0] sm:$0xff]  ;;  %v86_v22 = vld [vmem:[%s4007_s0 + $0x240] sm:$0xff]  ;;  %v171_v27 = vld [vmem:[%s4008_s1 + $0xe8] sm:$0xff] }
  0x1c   :  { %2601 = vmatpush3.msra.mxu1 %v150_v42  ;;  %2605 = vmatprep.subr.mxu0 %v2901_v18  ;;  %v78_v23 = vld [vmem:[%s4007_s0 + $0x200] sm:$0xff]  ;;  %v87_v28 = vld [vmem:[%s4007_s0 + $0x248] sm:$0xff]  ;;  %v88_v32 = vld [vmem:[%s4007_s0 + $0x250] sm:$0xff] }
  0x1d   :  { %2624 = vmatprep.subr.mxu1 %v2901_v18  ;;  %v162_v31 = vld [vmem:[%s4008_s1 + $0xa0] sm:$0xff]  ;;  %v80_v33 = vld [vmem:[%s4007_s0 + $0x210] sm:$0xff]  ;;  %v161_v34 = vld [vmem:[%s4008_s1 + $0x98] sm:$0xff] }
  0x1e   :  { %383 = vxpose.xlu1.b32.end [8/8] (short) (narrow) %v29_v14, 8  ;;  %v68_v14 = vld [vmem:[%s4007_s0 + $0x1b0] sm:$0xff]  ;;  %v89_v38 = vld [vmem:[%s4007_s0 + $0x258] sm:$0xff]  ;;  %v167_v41 = vld [vmem:[%s4008_s1 + $0xc8] sm:$0xff] }
  0x1f   :  { %277 = vxpose.xlu0.b32.end [8/8] (short) (narrow) %v21_v15, 8  ;;  %v77_v15 = vld [vmem:[%s4007_s0 + $0x1f8] sm:$0xff]  ;;  %v160_v37 = vld [vmem:[%s4008_s1 + $0x90] sm:$0xff]  ;;  %v90_v42 = vld [vmem:[%s4007_s0 + $0x260] sm:$0xff] }
  0x22   :  { %586 = vxpose.xlu1.b32.start [1/8] (short) (narrow) %v38_v16, 8  ;;  %v69_v16 = vld [vmem:[%s4007_s0 + $0x1b8] sm:$0xff] }
  0x23   :  { %481 = vxpose.xlu0.b32.start [1/8] (short) (narrow) %v30_v17, 8  ;;  %v165_v17 = vld [vmem:[%s4008_s1 + $0xb8] sm:$0xff] }
  0x26   :  { %587 = vxpose.xlu1.b32.cont [2/8] (short) (narrow) %v39_v25, 8  ;;  %v164_v25 = vld [vmem:[%s4008_s1 + $0xb0] sm:$0xff] }
  0x27   :  { %482 = vxpose.xlu0.b32.cont [2/8] (short) (narrow) %v31_v26, 8  ;;  %v163_v26 = vld [vmem:[%s4008_s1 + $0xa8] sm:$0xff] }
  0x2a   :  { %588 = vxpose.xlu1.b32.cont [3/8] (short) (narrow) %v40_v29, 8  ;;  %v79_v29 = vld [vmem:[%s4007_s0 + $0x208] sm:$0xff] }
  0x2b   :  { %483 = vxpose.xlu0.b32.cont [3/8] (short) (narrow) %v32_v30, 8  ;;  %v170_v30 = vld [vmem:[%s4008_s1 + $0xe0] sm:$0xff] }
  0x2e   :  { %589 = vxpose.xlu1.b32.cont [4/8] (short) (narrow) %v41_v35, 8  ;;  %v169_v35 = vld [vmem:[%s4008_s1 + $0xd8] sm:$0xff] }
  0x2f   :  { %484 = vxpose.xlu0.b32.cont [4/8] (short) (narrow) %v33_v36, 8  ;;  %v168_v36 = vld [vmem:[%s4008_s1 + $0xd0] sm:$0xff] }
  0x32   :  { %590 = vxpose.xlu1.b32.cont [5/8] (short) (narrow) %v42_v39, 8  ;;  %v81_v39 = vld [vmem:[%s4007_s0 + $0x218] sm:$0xff] }
  0x33   :  { %485 = vxpose.xlu0.b32.cont [5/8] (short) (narrow) %v34_v40, 8  ;;  %v159_v40 = vld [vmem:[%s4008_s1 + $0x88] sm:$0xff] }
  0x36   :  { %591 = vxpose.xlu1.b32.cont [6/8] (short) (narrow) %v43_v43, 8  ;;  %v82_v43 = vld [vmem:[%s4007_s0 + $0x220] sm:$0xff] }
  0x37   :  { %486 = vxpose.xlu0.b32.cont [6/8] (short) (narrow) %v35_v44, 8  ;;  %v166_v44 = vld [vmem:[%s4008_s1 + $0xc0] sm:$0xff] }
  0x3a   :  { %592 = vxpose.xlu1.b32.cont [7/8] (short) (narrow) %v44_v45, 8  ;;  %v158_v45 = vld [vmem:[%s4008_s1 + $0x80] sm:$0xff] }
  0x3b   :  { %487 = vxpose.xlu0.b32.cont [7/8] (short) (narrow) %v36_v46, 8  ;;  %v91_v46 = vld [vmem:[%s4007_s0 + $0x268] sm:$0xff] }
  0x3e   :  { %593 = vxpose.xlu1.b32.end [8/8] (short) (narrow) %v45_v47, 8  ;;  %v83_v47 = vld [vmem:[%s4007_s0 + $0x228] sm:$0xff] }
  0x3f   :  { %488 = vxpose.xlu0.b32.end [8/8] (short) (narrow) %v37_v48, 8  ;;  %v92_v48 = vld [vmem:[%s4007_s0 + $0x270] sm:$0xff] }
  0x42   :  { %796 = vxpose.xlu1.b32.start [1/8] (short) (narrow) %v54_v49, 8  ;;  %v84_v49 = vld [vmem:[%s4007_s0 + $0x230] sm:$0xff] }
  0x43   :  { %691 = vxpose.xlu0.b32.start [1/8] (short) (narrow) %v46_v50, 8  ;;  %v93_v50 = vld [vmem:[%s4007_s0 + $0x278] sm:$0xff] }
  0x46   :  { %797 = vxpose.xlu1.b32.cont [2/8] (short) (narrow) %v55_v51, 8  ;;  %v85_v51 = vld [vmem:[%s4007_s0 + $0x238] sm:$0xff] }
  0x47   :  { %692 = vxpose.xlu0.b32.cont [2/8] (short) (narrow) %v47_v52, 8  ;;  %v181_v52 = vld [vmem:[%s4008_s1 + $0x138] sm:$0xff] }
  0x4a   :  { %798 = vxpose.xlu1.b32.cont [3/8] (short) (narrow) %v56_v53, 8  ;;  %v189_v53 = vld [vmem:[%s4008_s1 + $0x178] sm:$0xff] }
  0x4b   :  { %693 = vxpose.xlu0.b32.cont [3/8] (short) (narrow) %v48_v54, 8 }
  0x4e   :  { %799 = vxpose.xlu1.b32.cont [4/8] (short) (narrow) %v57_v55, 8 }
  0x4f   :  { %694 = vxpose.xlu0.b32.cont [4/8] (short) (narrow) %v49_v56, 8  ;;  %v102_v56 = vld [vmem:[%s4007_s0 + $0x2c0] sm:$0xff] }
  0x52   :  { %800 = vxpose.xlu1.b32.cont [5/8] (short) (narrow) %v58_v57, 8  ;;  %v94_v57 = vld [vmem:[%s4007_s0 + $0x280] sm:$0xff] }
  0x53   :  { %695 = vxpose.xlu0.b32.cont [5/8] (short) (narrow) %v50_v58, 8  ;;  %v188_v58 = vld [vmem:[%s4008_s1 + $0x170] sm:$0xff] }
  0x56   :  { %801 = vxpose.xlu1.b32.cont [6/8] (short) (narrow) %v59_v59, 8  ;;  %v180_v59 = vld [vmem:[%s4008_s1 + $0x130] sm:$0xff] }
  0x57   :  { %696 = vxpose.xlu0.b32.cont [6/8] (short) (narrow) %v51_v60, 8  ;;  %v179_v60 = vld [vmem:[%s4008_s1 + $0x128] sm:$0xff] }
  0x5a   :  { %802 = vxpose.xlu1.b32.cont [7/8] (short) (narrow) %v60_v61, 8  ;;  %v187_v61 = vld [vmem:[%s4008_s1 + $0x168] sm:$0xff] }
  0x5b   :  { %697 = vxpose.xlu0.b32.cont [7/8] (short) (narrow) %v52_v62, 8  ;;  %v103_v62 = vld [vmem:[%s4007_s0 + $0x2c8] sm:$0xff] }
  0x5e   :  { %803 = vxpose.xlu1.b32.end [8/8] (short) (narrow) %v61_v63, 8  ;;  %v95_v63 = vld [vmem:[%s4007_s0 + $0x288] sm:$0xff] }
  0x5f   :  { %698 = vxpose.xlu0.b32.end [8/8] (short) (narrow) %v53_v0, 8  ;;  %v186_v0 = vld [vmem:[%s4008_s1 + $0x160] sm:$0xff] }
  0x62   :  { %1006 = vxpose.xlu1.b32.start [1/8] (short) (narrow) %v70_v1, 8  ;;  %v178_v1 = vld [vmem:[%s4008_s1 + $0x120] sm:$0xff] }
  0x63   :  { %901 = vxpose.xlu0.b32.start [1/8] (short) (narrow) %v62_v2, 8  ;;  %v104_v2 = vld [vmem:[%s4007_s0 + $0x2d0] sm:$0xff] }
  0x66   :  { %1007 = vxpose.xlu1.b32.cont [2/8] (short) (narrow) %v71_v3, 8  ;;  %v96_v3 = vld [vmem:[%s4007_s0 + $0x290] sm:$0xff] }
  0x67   :  { %902 = vxpose.xlu0.b32.cont [2/8] (short) (narrow) %v63_v4, 8  ;;  %v177_v4 = vld [vmem:[%s4008_s1 + $0x118] sm:$0xff] }
  0x6a   :  { %1008 = vxpose.xlu1.b32.cont [3/8] (short) (narrow) %v72_v5, 8  ;;  %v185_v5 = vld [vmem:[%s4008_s1 + $0x158] sm:$0xff] }
  0x6b   :  { %903 = vxpose.xlu0.b32.cont [3/8] (short) (narrow) %v64_v6, 8  ;;  %v184_v6 = vld [vmem:[%s4008_s1 + $0x150] sm:$0xff] }
  0x6e   :  { %1009 = vxpose.xlu1.b32.cont [4/8] (short) (narrow) %v73_v7, 8  ;;  %v176_v7 = vld [vmem:[%s4008_s1 + $0x110] sm:$0xff] }
  0x6f   :  { %904 = vxpose.xlu0.b32.cont [4/8] (short) (narrow) %v65_v8, 8  ;;  %v105_v8 = vld [vmem:[%s4007_s0 + $0x2d8] sm:$0xff] }
  0x72   :  { %1010 = vxpose.xlu1.b32.cont [5/8] (short) (narrow) %v74_v9, 8  ;;  %v97_v9 = vld [vmem:[%s4007_s0 + $0x298] sm:$0xff] }
  0x73   :  { %905 = vxpose.xlu0.b32.cont [5/8] (short) (narrow) %v66_v10, 8  ;;  %v175_v10 = vld [vmem:[%s4008_s1 + $0x108] sm:$0xff] }
  0x76   :  { %1011 = vxpose.xlu1.b32.cont [6/8] (short) (narrow) %v75_v11, 8  ;;  %v183_v11 = vld [vmem:[%s4008_s1 + $0x148] sm:$0xff] }
  0x77   :  { %906 = vxpose.xlu0.b32.cont [6/8] (short) (narrow) %v67_v12, 8  ;;  %v106_v12 = vld [vmem:[%s4007_s0 + $0x2e0] sm:$0xff] }
  0x7a   :  { %1012 = vxpose.xlu1.b32.cont [7/8] (short) (narrow) %v76_v13, 8  ;;  %v98_v13 = vld [vmem:[%s4007_s0 + $0x2a0] sm:$0xff] }
  0x7b   :  { %907 = vxpose.xlu0.b32.cont [7/8] (short) (narrow) %v68_v14, 8  ;;  %v182_v14 = vld [vmem:[%s4008_s1 + $0x140] sm:$0xff] }
  0x7e   :  { %1013 = vxpose.xlu1.b32.end [8/8] (short) (narrow) %v77_v15, 8  ;;  %v392_v20 = vpop.trf.xlu1  ;;  %v174_v15 = vld [vmem:[%s4008_s1 + $0x100] sm:$0xff] }
  0x7f   :  { %908 = vxpose.xlu0.b32.end [8/8] (short) (narrow) %v69_v16, 8  ;;  %v286_v21 = vpop.trf.xlu0  ;;  %2603 = vmatmul.mubr.msk.f32.vlgmr.msra.gmra.mxu1 %vm302_vm1, %v392_v20  ;;  %v107_v16 = vld [vmem:[%s4007_s0 + $0x2e8] sm:$0xff]  ;;  %v100_v20 = vld [vmem:[%s4007_s0 + $0x2b0] sm:$0xff] }
  0x80   :  { %2584 = vmatmul.mubr.msk.f32.vlgmr.msra.gmra.mxu0 %vm302_vm1, %v286_v21  ;;  %2625 = vmatpush3.msra.mxu1 %v173_v19  ;;  %v108_v19 = vld [vmem:[%s4007_s0 + $0x2f0] sm:$0xff]  ;;  %v109_v21 = vld [vmem:[%s4007_s0 + $0x2f8] sm:$0xff] }
  0x81   :  { %2606 = vmatpush3.msra.mxu0 %v165_v17  ;;  %2626 = vmatprep.subr.mxu1 %v2901_v18  ;;  %v99_v17 = vld [vmem:[%s4007_s0 + $0x2a8] sm:$0xff] }
  0x82   :  { %2607 = vmatprep.subr.mxu0 %v2901_v18  ;;  %1216 = vxpose.xlu1.b32.start [1/8] (short) (narrow) %v86_v22, 8  ;;  %v101_v22 = vld [vmem:[%s4007_s0 + $0x2b8] sm:$0xff] }
  0x83   :  { %1111 = vxpose.xlu0.b32.start [1/8] (short) (narrow) %v78_v23, 8  ;;  %2627 = vmatpush3.msra.mxu1 %v172_v24  ;;  %v197_v23 = vld [vmem:[%s4008_s1 + $0x1b8] sm:$0xff] }
  0x84   :  { %2608 = vmatpush3.msra.mxu0 %v164_v25  ;;  %2628 = vmatprep.subr.mxu1 %v2901_v18  ;;  %v205_v24 = vld [vmem:[%s4008_s1 + $0x1f8] sm:$0xff] }
  0x85   :  { %2609 = vmatprep.subr.mxu0 %v2901_v18  ;;  %2629 = vmatpush3.msra.mxu1 %v171_v27  ;;  %v118_v27 = vld [vmem:[%s4007_s0 + $0x340] sm:$0xff] }
  0x86   :  { %2610 = vmatpush3.msra.mxu0 %v163_v26  ;;  %1217 = vxpose.xlu1.b32.cont [2/8] (short) (narrow) %v87_v28, 8  ;;  %v110_v28 = vld [vmem:[%s4007_s0 + $0x300] sm:$0xff] }
  0x87   :  { %1112 = vxpose.xlu0.b32.cont [2/8] (short) (narrow) %v79_v29, 8  ;;  %2611 = vmatprep.subr.mxu0 %v2901_v18  ;;  %v204_v29 = vld [vmem:[%s4008_s1 + $0x1f0] sm:$0xff] }
  0x88   :  { %2630 = vmatprep.subr.mxu1 %v2901_v18  ;;  %2612 = vmatpush3.msra.mxu0 %v162_v31  ;;  %v195_v31 = vld [vmem:[%s4008_s1 + $0x1a8] sm:$0xff] }
  0x89   :  { %2631 = vmatpush3.msra.mxu1 %v170_v30  ;;  %2613 = vmatprep.subr.mxu0 %v2901_v18  ;;  %v196_v30 = vld [vmem:[%s4008_s1 + $0x1b0] sm:$0xff] }
  0x8a   :  { %2632 = vmatprep.subr.mxu1 %v2901_v18  ;;  %1218 = vxpose.xlu1.b32.cont [3/8] (short) (narrow) %v88_v32, 8  ;;  %v203_v32 = vld [vmem:[%s4008_s1 + $0x1e8] sm:$0xff] }
  0x8b   :  { %1113 = vxpose.xlu0.b32.cont [3/8] (short) (narrow) %v80_v33, 8  ;;  %2614 = vmatpush3.msra.mxu0 %v161_v34  ;;  %v119_v33 = vld [vmem:[%s4007_s0 + $0x348] sm:$0xff] }
  0x8c   :  { %2633 = vmatpush3.msra.mxu1 %v169_v35  ;;  %2615 = vmatprep.subr.mxu0 %v2901_v18  ;;  %v111_v34 = vld [vmem:[%s4007_s0 + $0x308] sm:$0xff]  ;;  %v202_v35 = vld [vmem:[%s4008_s1 + $0x1e0] sm:$0xff] }
  0x8d   :  { %2634 = vmatprep.subr.mxu1 %v2901_v18  ;;  %2616 = vmatpush3.msra.mxu0 %v160_v37  ;;  %v120_v37 = vld [vmem:[%s4007_s0 + $0x350] sm:$0xff] }
  0x8e   :  { %2635 = vmatpush3.msra.mxu1 %v168_v36  ;;  %1219 = vxpose.xlu1.b32.cont [4/8] (short) (narrow) %v89_v38, 8  ;;  %v194_v36 = vld [vmem:[%s4008_s1 + $0x1a0] sm:$0xff]  ;;  %v112_v38 = vld [vmem:[%s4007_s0 + $0x310] sm:$0xff] }
  0x8f   :  { %1114 = vxpose.xlu0.b32.cont [4/8] (short) (narrow) %v81_v39, 8  ;;  %2617 = vmatprep.subr.mxu0 %v2901_v18  ;;  %v193_v39 = vld [vmem:[%s4008_s1 + $0x198] sm:$0xff] }
  0x90   :  { %2636 = vmatprep.subr.mxu1 %v2901_v18  ;;  %2618 = vmatpush3.msra.mxu0 %v159_v40  ;;  %v201_v40 = vld [vmem:[%s4008_s1 + $0x1d8] sm:$0xff] }
  0x91   :  { %2637 = vmatpush3.msra.mxu1 %v167_v41  ;;  %2619 = vmatprep.subr.mxu0 %v2901_v18  ;;  %v200_v41 = vld [vmem:[%s4008_s1 + $0x1d0] sm:$0xff] }
  0x92   :  { %2638 = vmatprep.subr.mxu1 %v2901_v18  ;;  %1220 = vxpose.xlu1.b32.cont [5/8] (short) (narrow) %v90_v42, 8  ;;  %v192_v42 = vld [vmem:[%s4008_s1 + $0x190] sm:$0xff] }
  0x93   :  { %1115 = vxpose.xlu0.b32.cont [5/8] (short) (narrow) %v82_v43, 8  ;;  %2639 = vmatpush3.msra.mxu1 %v166_v44  ;;  %v121_v43 = vld [vmem:[%s4007_s0 + $0x358] sm:$0xff] }
  0x94   :  { %2620 = vmatpush3.msra.mxu0 %v158_v45  ;;  %2640 = vmatprep.mubr.msk.f32.mxu1 %vm2902_vm0, %v2901_v18  ;;  %v113_v44 = vld [vmem:[%s4007_s0 + $0x318] sm:$0xff]  ;;  %v191_v45 = vld [vmem:[%s4008_s1 + $0x188] sm:$0xff] }
  0x95   :  { %2662 = vmatprep.subr.mxu1 %v2901_v18  ;;  %2621 = vmatprep.mubr.msk.f32.mxu0 %vm2902_vm0, %v2901_v18 }
  0x96   :  { %2643 = vmatprep.subr.mxu0 %v2901_v18  ;;  %1221 = vxpose.xlu1.b32.cont [6/8] (short) (narrow) %v91_v46, 8  ;;  %v199_v46 = vld [vmem:[%s4008_s1 + $0x1c8] sm:$0xff] }
  0x97   :  { %1116 = vxpose.xlu0.b32.cont [6/8] (short) (narrow) %v83_v47, 8  ;;  %v122_v47 = vld [vmem:[%s4007_s0 + $0x360] sm:$0xff] }
  0x9a   :  { %1222 = vxpose.xlu1.b32.cont [7/8] (short) (narrow) %v92_v48, 8  ;;  %v114_v48 = vld [vmem:[%s4007_s0 + $0x320] sm:$0xff] }
  0x9b   :  { %1117 = vxpose.xlu0.b32.cont [7/8] (short) (narrow) %v84_v49, 8  ;;  %v198_v49 = vld [vmem:[%s4008_s1 + $0x1c0] sm:$0xff] }
  0x9e   :  { %1223 = vxpose.xlu1.b32.end [8/8] (short) (narrow) %v93_v50, 8  ;;  %v602_v54 = vpop.trf.xlu1  ;;  %v190_v50 = vld [vmem:[%s4008_s1 + $0x180] sm:$0xff] }
  0x9f   :  { %1118 = vxpose.xlu0.b32.end [8/8] (short) (narrow) %v85_v51, 8  ;;  %v497_v55 = vpop.trf.xlu0  ;;  %2641 = vmatmul.mubr.msk.f32.vlgmr.msra.gmra.mxu1 %vm302_vm1, %v602_v54  ;;  %v123_v51 = vld [vmem:[%s4007_s0 + $0x368] sm:$0xff]  ;;  %v116_v54 = vld [vmem:[%s4007_s0 + $0x330] sm:$0xff] }
  0xa0   :  { %2622 = vmatmul.mubr.msk.f32.vlgmr.msra.gmra.mxu0 %vm302_vm1, %v497_v55  ;;  %2663 = vmatpush3.msra.mxu1 %v189_v53  ;;  %v124_v53 = vld [vmem:[%s4007_s0 + $0x370] sm:$0xff]  ;;  %v125_v55 = vld [vmem:[%s4007_s0 + $0x378] sm:$0xff] }
  0xa1   :  { %2644 = vmatpush3.msra.mxu0 %v181_v52  ;;  %2664 = vmatprep.subr.mxu1 %v2901_v18  ;;  %v115_v52 = vld [vmem:[%s4007_s0 + $0x328] sm:$0xff] }
  0xa2   :  { %2645 = vmatprep.subr.mxu0 %v2901_v18  ;;  %1426 = vxpose.xlu1.b32.start [1/8] (short) (narrow) %v102_v56, 8  ;;  %v117_v56 = vld [vmem:[%s4007_s0 + $0x338] sm:$0xff] }
  0xa3   :  { %1321 = vxpose.xlu0.b32.start [1/8] (short) (narrow) %v94_v57, 8  ;;  %2665 = vmatpush3.msra.mxu1 %v188_v58  ;;  %v213_v57 = vld [vmem:[%s4008_s1 + $0x238] sm:$0xff] }
  0xa4   :  { %2646 = vmatpush3.msra.mxu0 %v180_v59  ;;  %2666 = vmatprep.subr.mxu1 %v2901_v18  ;;  %v221_v58 = vld [vmem:[%s4008_s1 + $0x278] sm:$0xff] }
  0xa5   :  { %2647 = vmatprep.subr.mxu0 %v2901_v18  ;;  %2667 = vmatpush3.msra.mxu1 %v187_v61  ;;  %v134_v61 = vld [vmem:[%s4007_s0 + $0x3c0] sm:$0xff] }
  0xa6   :  { %2648 = vmatpush3.msra.mxu0 %v179_v60  ;;  %1427 = vxpose.xlu1.b32.cont [2/8] (short) (narrow) %v103_v62, 8  ;;  %v126_v62 = vld [vmem:[%s4007_s0 + $0x380] sm:$0xff] }
  0xa7   :  { %1322 = vxpose.xlu0.b32.cont [2/8] (short) (narrow) %v95_v63, 8  ;;  %2649 = vmatprep.subr.mxu0 %v2901_v18  ;;  %v212_v63 = vld [vmem:[%s4008_s1 + $0x230] sm:$0xff] }
  0xa8   :  { %2668 = vmatprep.subr.mxu1 %v2901_v18  ;;  %2650 = vmatpush3.msra.mxu0 %v178_v1  ;;  %v211_v1 = vld [vmem:[%s4008_s1 + $0x228] sm:$0xff] }
  0xa9   :  { %2669 = vmatpush3.msra.mxu1 %v186_v0  ;;  %2651 = vmatprep.subr.mxu0 %v2901_v18  ;;  %v220_v0 = vld [vmem:[%s4008_s1 + $0x270] sm:$0xff] }
  0xaa   :  { %2670 = vmatprep.subr.mxu1 %v2901_v18  ;;  %1428 = vxpose.xlu1.b32.cont [3/8] (short) (narrow) %v104_v2, 8  ;;  %v219_v2 = vld [vmem:[%s4008_s1 + $0x268] sm:$0xff] }
  0xab   :  { %1323 = vxpose.xlu0.b32.cont [3/8] (short) (narrow) %v96_v3, 8  ;;  %2652 = vmatpush3.msra.mxu0 %v177_v4  ;;  %v135_v3 = vld [vmem:[%s4007_s0 + $0x3c8] sm:$0xff] }
  0xac   :  { %2671 = vmatpush3.msra.mxu1 %v185_v5  ;;  %2653 = vmatprep.subr.mxu0 %v2901_v18  ;;  %v127_v4 = vld [vmem:[%s4007_s0 + $0x388] sm:$0xff]  ;;  %v210_v5 = vld [vmem:[%s4008_s1 + $0x220] sm:$0xff] }
  0xad   :  { %2672 = vmatprep.subr.mxu1 %v2901_v18  ;;  %2654 = vmatpush3.msra.mxu0 %v176_v7  ;;  %v136_v7 = vld [vmem:[%s4007_s0 + $0x3d0] sm:$0xff] }
  0xae   :  { %2673 = vmatpush3.msra.mxu1 %v184_v6  ;;  %1429 = vxpose.xlu1.b32.cont [4/8] (short) (narrow) %v105_v8, 8  ;;  %v218_v6 = vld [vmem:[%s4008_s1 + $0x260] sm:$0xff]  ;;  %v128_v8 = vld [vmem:[%s4007_s0 + $0x390] sm:$0xff] }
  0xaf   :  { %1324 = vxpose.xlu0.b32.cont [4/8] (short) (narrow) %v97_v9, 8  ;;  %2655 = vmatprep.subr.mxu0 %v2901_v18  ;;  %v209_v9 = vld [vmem:[%s4008_s1 + $0x218] sm:$0xff] }
  0xb0   :  { %2674 = vmatprep.subr.mxu1 %v2901_v18  ;;  %2656 = vmatpush3.msra.mxu0 %v175_v10  ;;  %v217_v10 = vld [vmem:[%s4008_s1 + $0x258] sm:$0xff] }
  0xb1   :  { %2675 = vmatpush3.msra.mxu1 %v183_v11  ;;  %2657 = vmatprep.subr.mxu0 %v2901_v18  ;;  %v208_v11 = vld [vmem:[%s4008_s1 + $0x210] sm:$0xff] }
  0xb2   :  { %2676 = vmatprep.subr.mxu1 %v2901_v18  ;;  %1430 = vxpose.xlu1.b32.cont [5/8] (short) (narrow) %v106_v12, 8  ;;  %v216_v12 = vld [vmem:[%s4008_s1 + $0x250] sm:$0xff] }
  0xb3   :  { %1325 = vxpose.xlu0.b32.cont [5/8] (short) (narrow) %v98_v13, 8  ;;  %2677 = vmatpush3.msra.mxu1 %v182_v14  ;;  %v137_v13 = vld [vmem:[%s4007_s0 + $0x3d8] sm:$0xff] }
  0xb4   :  { %2658 = vmatpush3.msra.mxu0 %v174_v15  ;;  %2678 = vmatprep.mubr.msk.f32.mxu1 %vm2902_vm0, %v2901_v18  ;;  %v129_v14 = vld [vmem:[%s4007_s0 + $0x398] sm:$0xff]  ;;  %v207_v15 = vld [vmem:[%s4008_s1 + $0x208] sm:$0xff] }
  0xb5   :  { %2700 = vmatprep.subr.mxu1 %v2901_v18  ;;  %2659 = vmatprep.mubr.msk.f32.mxu0 %vm2902_vm0, %v2901_v18 }
  0xb6   :  { %2681 = vmatprep.subr.mxu0 %v2901_v18  ;;  %1431 = vxpose.xlu1.b32.cont [6/8] (short) (narrow) %v107_v16, 8  ;;  %v215_v16 = vld [vmem:[%s4008_s1 + $0x248] sm:$0xff] }
  0xb7   :  { %1326 = vxpose.xlu0.b32.cont [6/8] (short) (narrow) %v99_v17, 8  ;;  %v138_v17 = vld [vmem:[%s4007_s0 + $0x3e0] sm:$0xff] }
  0xba   :  { %1432 = vxpose.xlu1.b32.cont [7/8] (short) (narrow) %v108_v19, 8  ;;  %v130_v19 = vld [vmem:[%s4007_s0 + $0x3a0] sm:$0xff] }
  0xbb   :  { %1327 = vxpose.xlu0.b32.cont [7/8] (short) (narrow) %v100_v20, 8  ;;  %v206_v20 = vld [vmem:[%s4008_s1 + $0x200] sm:$0xff] }
  0xbe   :  { %1433 = vxpose.xlu1.b32.end [8/8] (short) (narrow) %v109_v21, 8  ;;  %v812_v25 = vpop.trf.xlu1  ;;  %v214_v21 = vld [vmem:[%s4008_s1 + $0x240] sm:$0xff] }
  0xbf   :  { %1328 = vxpose.xlu0.b32.end [8/8] (short) (narrow) %v101_v22, 8  ;;  %v707_v26 = vpop.trf.xlu0  ;;  %2679 = vmatmul.mubr.msk.f32.vlgmr.msra.gmra.mxu1 %vm302_vm1, %v812_v25  ;;  %v139_v22 = vld [vmem:[%s4007_s0 + $0x3e8] sm:$0xff]  ;;  %v132_v25 = vld [vmem:[%s4007_s0 + $0x3b0] sm:$0xff] }
  0xc0   :  { %2660 = vmatmul.mubr.msk.f32.vlgmr.msra.gmra.mxu0 %vm302_vm1, %v707_v26  ;;  %2701 = vmatpush3.msra.mxu1 %v205_v24  ;;  %v140_v24 = vld [vmem:[%s4007_s0 + $0x3f0] sm:$0xff]  ;;  %v141_v26 = vld [vmem:[%s4007_s0 + $0x3f8] sm:$0xff] }
  0xc1   :  { %2682 = vmatpush3.msra.mxu0 %v197_v23  ;;  %2702 = vmatprep.subr.mxu1 %v2901_v18  ;;  %v131_v23 = vld [vmem:[%s4007_s0 + $0x3a8] sm:$0xff] }
  0xc2   :  { %2683 = vmatprep.subr.mxu0 %v2901_v18  ;;  %1636 = vxpose.xlu1.b32.start [1/8] (short) (narrow) %v118_v27, 8  ;;  %v133_v27 = vld [vmem:[%s4007_s0 + $0x3b8] sm:$0xff] }
  0xc3   :  { %1531 = vxpose.xlu0.b32.start [1/8] (short) (narrow) %v110_v28, 8  ;;  %2703 = vmatpush3.msra.mxu1 %v204_v29  ;;  %v229_v28 = vld [vmem:[%s4008_s1 + $0x2b8] sm:$0xff] }
  0xc4   :  { %2684 = vmatpush3.msra.mxu0 %v196_v30  ;;  %2704 = vmatprep.subr.mxu1 %v2901_v18  ;;  %v237_v29 = vld [vmem:[%s4008_s1 + $0x2f8] sm:$0xff] }
  0xc5   :  { %2685 = vmatprep.subr.mxu0 %v2901_v18  ;;  %2705 = vmatpush3.msra.mxu1 %v203_v32  ;;  %v228_v32 = vld [vmem:[%s4008_s1 + $0x2b0] sm:$0xff] }
  0xc6   :  { %2686 = vmatpush3.msra.mxu0 %v195_v31  ;;  %1637 = vxpose.xlu1.b32.cont [2/8] (short) (narrow) %v119_v33, 8  ;;  %v236_v33 = vld [vmem:[%s4008_s1 + $0x2f0] sm:$0xff] }
  0xc7   :  { %1532 = vxpose.xlu0.b32.cont [2/8] (short) (narrow) %v111_v34, 8  ;;  %2687 = vmatprep.subr.mxu0 %v2901_v18  ;;  %v227_v34 = vld [vmem:[%s4008_s1 + $0x2a8] sm:$0xff] }
  0xc8   :  { %2706 = vmatprep.subr.mxu1 %v2901_v18  ;;  %2688 = vmatpush3.msra.mxu0 %v194_v36  ;;  %v226_v36 = vld [vmem:[%s4008_s1 + $0x2a0] sm:$0xff] }
  0xc9   :  { %2707 = vmatpush3.msra.mxu1 %v202_v35  ;;  %2689 = vmatprep.subr.mxu0 %v2901_v18  ;;  %v235_v35 = vld [vmem:[%s4008_s1 + $0x2e8] sm:$0xff] }
  0xca   :  { %2708 = vmatprep.subr.mxu1 %v2901_v18  ;;  %1638 = vxpose.xlu1.b32.cont [3/8] (short) (narrow) %v120_v37, 8  ;;  %v234_v37 = vld [vmem:[%s4008_s1 + $0x2e0] sm:$0xff] }
  0xcb   :  { %1533 = vxpose.xlu0.b32.cont [3/8] (short) (narrow) %v112_v38, 8  ;;  %2690 = vmatpush3.msra.mxu0 %v193_v39  ;;  %v225_v38 = vld [vmem:[%s4008_s1 + $0x298] sm:$0xff] }
  0xcc   :  { %2709 = vmatpush3.msra.mxu1 %v201_v40  ;;  %2691 = vmatprep.subr.mxu0 %v2901_v18  ;;  %v233_v39 = vld [vmem:[%s4008_s1 + $0x2d8] sm:$0xff]  ;;  %v224_v40 = vld [vmem:[%s4008_s1 + $0x290] sm:$0xff] }
  0xcd   :  { %2710 = vmatprep.subr.mxu1 %v2901_v18  ;;  %2692 = vmatpush3.msra.mxu0 %v192_v42  ;;  %v223_v42 = vld [vmem:[%s4008_s1 + $0x288] sm:$0xff] }
  0xce   :  { %2711 = vmatpush3.msra.mxu1 %v200_v41  ;;  %1639 = vxpose.xlu1.b32.cont [4/8] (short) (narrow) %v121_v43, 8  ;;  %v232_v41 = vld [vmem:[%s4008_s1 + $0x2d0] sm:$0xff]  ;;  %v231_v43 = vld [vmem:[%s4008_s1 + $0x2c8] sm:$0xff] }
  0xcf   :  { %1534 = vxpose.xlu0.b32.cont [4/8] (short) (narrow) %v113_v44, 8  ;;  %2693 = vmatprep.subr.mxu0 %v2901_v18  ;;  %v230_v44 = vld [vmem:[%s4008_s1 + $0x2c0] sm:$0xff] }
  0xd0   :  { %2712 = vmatprep.subr.mxu1 %v2901_v18  ;;  %2694 = vmatpush3.msra.mxu0 %v191_v45  ;;  %v222_v45 = vld [vmem:[%s4008_s1 + $0x280] sm:$0xff] }
  0xd1   :  { %2713 = vmatpush3.msra.mxu1 %v199_v46  ;;  %2695 = vmatprep.subr.mxu0 %v2901_v18  ;;  %v245_v46 = vld [vmem:[%s4008_s1 + $0x338] sm:$0xff] }
  0xd2   :  { %2714 = vmatprep.subr.mxu1 %v2901_v18  ;;  %1640 = vxpose.xlu1.b32.cont [5/8] (short) (narrow) %v122_v47, 8  ;;  %v253_v47 = vld [vmem:[%s4008_s1 + $0x378] sm:$0xff] }
  0xd3   :  { %1535 = vxpose.xlu0.b32.cont [5/8] (short) (narrow) %v114_v48, 8  ;;  %2715 = vmatpush3.msra.mxu1 %v198_v49 }
  0xd4   :  { %2716 = vmatprep.mubr.msk.f32.mxu1 %vm2902_vm0, %v2901_v18  ;;  %2696 = vmatpush3.msra.mxu0 %v190_v50  ;;  %v244_v50 = vld [vmem:[%s4008_s1 + $0x330] sm:$0xff] }
  0xd5   :  { %2697 = vmatprep.mubr.msk.f32.mxu0 %vm2902_vm0, %v2901_v18  ;;  %2719 = vmatprep.subr.mxu0 %v2901_v18 }
  0xd6   :  { %2738 = vmatprep.subr.mxu1 %v2901_v18  ;;  %1641 = vxpose.xlu1.b32.cont [6/8] (short) (narrow) %v123_v51, 8  ;;  %v252_v51 = vld [vmem:[%s4008_s1 + $0x370] sm:$0xff] }
  0xd7   :  { %1536 = vxpose.xlu0.b32.cont [6/8] (short) (narrow) %v115_v52, 8  ;;  %v243_v52 = vld [vmem:[%s4008_s1 + $0x328] sm:$0xff] }
  0xda   :  { %1642 = vxpose.xlu1.b32.cont [7/8] (short) (narrow) %v124_v53, 8  ;;  %v251_v53 = vld [vmem:[%s4008_s1 + $0x368] sm:$0xff] }
  0xdb   :  { %1537 = vxpose.xlu0.b32.cont [7/8] (short) (narrow) %v116_v54, 8  ;;  %v242_v54 = vld [vmem:[%s4008_s1 + $0x320] sm:$0xff] }
  0xde   :  { %1643 = vxpose.xlu1.b32.end [8/8] (short) (narrow) %v125_v55, 8  ;;  %v1022_v59 = vpop.trf.xlu1  ;;  %v250_v55 = vld [vmem:[%s4008_s1 + $0x360] sm:$0xff] }
  0xdf   :  { %1538 = vxpose.xlu0.b32.end [8/8] (short) (narrow) %v117_v56, 8  ;;  %v917_v60 = vpop.trf.xlu0  ;;  %2717 = vmatmul.mubr.msk.f32.vlgmr.msra.gmra.mxu1 %vm302_vm1, %v1022_v59  ;;  %v241_v56 = vld [vmem:[%s4008_s1 + $0x318] sm:$0xff]  ;;  %v248_v59 = vld [vmem:[%s4008_s1 + $0x350] sm:$0xff] }
  0xe0   :  { %2698 = vmatmul.mubr.msk.f32.vlgmr.msra.gmra.mxu0 %vm302_vm1, %v917_v60  ;;  %2739 = vmatpush3.msra.mxu1 %v221_v58  ;;  %v240_v58 = vld [vmem:[%s4008_s1 + $0x310] sm:$0xff]  ;;  %v239_v60 = vld [vmem:[%s4008_s1 + $0x308] sm:$0xff] }
  0xe1   :  { %2720 = vmatpush3.msra.mxu0 %v213_v57  ;;  %2740 = vmatprep.subr.mxu1 %v2901_v18  ;;  %v249_v57 = vld [vmem:[%s4008_s1 + $0x358] sm:$0xff] }
  0xe2   :  { %2721 = vmatprep.subr.mxu0 %v2901_v18  ;;  %1846 = vxpose.xlu1.b32.start [1/8] (short) (narrow) %v134_v61, 8  ;;  %v247_v61 = vld [vmem:[%s4008_s1 + $0x348] sm:$0xff] }
  0xe3   :  { %1741 = vxpose.xlu0.b32.start [1/8] (short) (narrow) %v126_v62, 8  ;;  %2722 = vmatpush3.msra.mxu0 %v212_v63  ;;  %v246_v62 = vld [vmem:[%s4008_s1 + $0x340] sm:$0xff] }
  0xe4   :  { %2741 = vmatpush3.msra.mxu1 %v220_v0  ;;  %2723 = vmatprep.subr.mxu0 %v2901_v18  ;;  %v238_v63 = vld [vmem:[%s4008_s1 + $0x300] sm:$0xff]  ;;  %v261_v0 = vld [vmem:[%s4008_s1 + $0x3b8] sm:$0xff] }
  0xe5   :  { %2742 = vmatprep.subr.mxu1 %v2901_v18  ;;  %2724 = vmatpush3.msra.mxu0 %v211_v1  ;;  %v269_v1 = vld [vmem:[%s4008_s1 + $0x3f8] sm:$0xff] }
  0xe6   :  { %2743 = vmatpush3.msra.mxu1 %v219_v2  ;;  %1847 = vxpose.xlu1.b32.cont [2/8] (short) (narrow) %v135_v3, 8 }
  0xe7   :  { %1742 = vxpose.xlu0.b32.cont [2/8] (short) (narrow) %v127_v4, 8  ;;  %2725 = vmatprep.subr.mxu0 %v2901_v18  ;;  %v260_v4 = vld [vmem:[%s4008_s1 + $0x3b0] sm:$0xff] }
  0xe8   :  { %2744 = vmatprep.subr.mxu1 %v2901_v18  ;;  %2726 = vmatpush3.msra.mxu0 %v210_v5  ;;  %v268_v5 = vld [vmem:[%s4008_s1 + $0x3f0] sm:$0xff] }
  0xe9   :  { %2745 = vmatpush3.msra.mxu1 %v218_v6  ;;  %2727 = vmatprep.subr.mxu0 %v2901_v18 }
  0xea   :  { %2746 = vmatprep.subr.mxu1 %v2901_v18  ;;  %1848 = vxpose.xlu1.b32.cont [3/8] (short) (narrow) %v136_v7, 8 }
  0xeb   :  { %1743 = vxpose.xlu0.b32.cont [3/8] (short) (narrow) %v128_v8, 8  ;;  %2728 = vmatpush3.msra.mxu0 %v209_v9  ;;  %v259_v8 = vld [vmem:[%s4008_s1 + $0x3a8] sm:$0xff] }
  0xec   :  { %2747 = vmatpush3.msra.mxu1 %v217_v10  ;;  %2729 = vmatprep.subr.mxu0 %v2901_v18  ;;  %v267_v9 = vld [vmem:[%s4008_s1 + $0x3e8] sm:$0xff] }
  0xed   :  { %2748 = vmatprep.subr.mxu1 %v2901_v18  ;;  %2730 = vmatpush3.msra.mxu0 %v208_v11 }
  0xee   :  { %2749 = vmatpush3.msra.mxu1 %v216_v12  ;;  %1849 = vxpose.xlu1.b32.cont [4/8] (short) (narrow) %v137_v13, 8  ;;  %v258_v12 = vld [vmem:[%s4008_s1 + $0x3a0] sm:$0xff] }
  0xef   :  { %1744 = vxpose.xlu0.b32.cont [4/8] (short) (narrow) %v129_v14, 8  ;;  %2731 = vmatprep.subr.mxu0 %v2901_v18  ;;  %v266_v13 = vld [vmem:[%s4008_s1 + $0x3e0] sm:$0xff]  ;;  %v257_v14 = vld [vmem:[%s4008_s1 + $0x398] sm:$0xff] }
  0xf0   :  { %2750 = vmatprep.subr.mxu1 %v2901_v18  ;;  %2732 = vmatpush3.msra.mxu0 %v207_v15  ;;  %v265_v15 = vld [vmem:[%s4008_s1 + $0x3d8] sm:$0xff] }
  0xf1   :  { %2751 = vmatpush3.msra.mxu1 %v215_v16  ;;  %2733 = vmatprep.subr.mxu0 %v2901_v18  ;;  %v256_v16 = vld [vmem:[%s4008_s1 + $0x390] sm:$0xff] }
  0xf2   :  { %2752 = vmatprep.subr.mxu1 %v2901_v18  ;;  %1850 = vxpose.xlu1.b32.cont [5/8] (short) (narrow) %v138_v17, 8  ;;  %v264_v17 = vld [vmem:[%s4008_s1 + $0x3d0] sm:$0xff] }
  0xf3   :  { %1745 = vxpose.xlu0.b32.cont [5/8] (short) (narrow) %v130_v19, 8  ;;  %2734 = vmatpush3.msra.mxu0 %v206_v20  ;;  %v255_v19 = vld [vmem:[%s4008_s1 + $0x388] sm:$0xff] }
  0xf4   :  { %2753 = vmatpush3.msra.mxu1 %v214_v21  ;;  %2754 = vmatprep.mubr.msk.f32.mxu1 %vm2902_vm0, %v2901_v18  ;;  %v263_v20 = vld [vmem:[%s4008_s1 + $0x3c8] sm:$0xff]  ;;  %v262_v21 = vld [vmem:[%s4008_s1 + $0x3c0] sm:$0xff] }
  0xf5   :  { %2776 = vmatprep.subr.mxu1 %v2901_v18  ;;  %2735 = vmatprep.mubr.msk.f32.mxu0 %vm2902_vm0, %v2901_v18 }
  0xf6   :  { %2757 = vmatprep.subr.mxu0 %v2901_v18  ;;  %1851 = vxpose.xlu1.b32.cont [6/8] (short) (narrow) %v139_v22, 8  ;;  %v254_v22 = vld [vmem:[%s4008_s1 + $0x380] sm:$0xff]  ;;  %s2905_s1 = smov 16  }
  0xf7   :  { %1746 = vxpose.xlu0.b32.cont [6/8] (short) (narrow) %v131_v23, 8  ;;  %v2903_v23 = vmov 1983009808  }
  0xfa   :  { %1852 = vxpose.xlu1.b32.cont [7/8] (short) (narrow) %v140_v24, 8  ;;  %v1954_v24 = vunpack.c.l.s4 %v2903_v23 }
  0xfb   :  { %1747 = vxpose.xlu0.b32.cont [7/8] (short) (narrow) %v132_v25, 8  ;;  %v1956_v25 = vlaneseq }
  0xfe   :  { %1853 = vxpose.xlu1.b32.end [8/8] (short) (narrow) %v141_v26, 8  ;;  %v1232_v30 = vpop.trf.xlu1  ;;  %v1955_v26 = vunpack.c.0.s8 %v1954_v24 }
  0xff   :  { %1748 = vxpose.xlu0.b32.end [8/8] (short) (narrow) %v133_v27, 8  ;;  %v1127_v31 = vpop.trf.xlu0  ;;  %2755 = vmatmul.mubr.msk.f32.vlgmr.msra.gmra.mxu1 %vm302_vm1, %v1232_v30  ;;  %v1957_v27 = vshrl.u32 %v1956_v25, 7 }
 0x100   :  { %2736 = vmatmul.mubr.msk.f32.vlgmr.msra.gmra.mxu0 %vm302_vm1, %v1127_v31  ;;  %2777 = vmatpush3.msra.mxu1 %v237_v29 }
 0x101   :  { %2758 = vmatpush3.msra.mxu0 %v229_v28  ;;  %2778 = vmatprep.subr.mxu1 %v2901_v18  ;;  %v3878_v30 = vsub.s32 %v1955_v26, %v1957_v27 }
 0x102   :  { %2759 = vmatprep.subr.mxu0 %v2901_v18  ;;  %2779 = vmatpush3.msra.mxu1 %v236_v33 }
 0x103   :  { %2760 = vmatpush3.msra.mxu0 %v228_v32  ;;  %2780 = vmatprep.subr.mxu1 %v2901_v18 }
 0x104   :  { %2761 = vmatprep.subr.mxu0 %v2901_v18  ;;  %2781 = vmatpush3.msra.mxu1 %v235_v35 }
 0x105   :  { %2762 = vmatpush3.msra.mxu0 %v227_v34  ;;  %2782 = vmatprep.subr.mxu1 %v2901_v18 }
 0x106   :  { %2763 = vmatprep.subr.mxu0 %v2901_v18  ;;  %2783 = vmatpush3.msra.mxu1 %v234_v37 }
 0x107   :  { %2764 = vmatpush3.msra.mxu0 %v226_v36  ;;  %2784 = vmatprep.subr.mxu1 %v2901_v18 }
 0x108   :  { %2765 = vmatprep.subr.mxu0 %v2901_v18  ;;  %2785 = vmatpush3.msra.mxu1 %v233_v39 }
 0x109   :  { %2766 = vmatpush3.msra.mxu0 %v225_v38  ;;  %2786 = vmatprep.subr.mxu1 %v2901_v18 }
 0x10a   :  { %2767 = vmatprep.subr.mxu0 %v2901_v18  ;;  %2787 = vmatpush3.msra.mxu1 %v232_v41 }
 0x10b   :  { %2768 = vmatpush3.msra.mxu0 %v224_v40  ;;  %2788 = vmatprep.subr.mxu1 %v2901_v18 }
 0x10c   :  { %2769 = vmatprep.subr.mxu0 %v2901_v18  ;;  %2789 = vmatpush3.msra.mxu1 %v231_v43 }
 0x10d   :  { %2770 = vmatpush3.msra.mxu0 %v223_v42  ;;  %2790 = vmatprep.subr.mxu1 %v2901_v18 }
 0x10e   :  { %2771 = vmatprep.subr.mxu0 %v2901_v18  ;;  %2791 = vmatpush3.msra.mxu1 %v230_v44 }
 0x10f   :  { %2792 = vmatprep.mubr.msk.f32.mxu1 %vm2902_vm0, %v2901_v18  ;;  %2772 = vmatpush3.msra.mxu0 %v222_v45 }
 0x110   :  { %2773 = vmatprep.mubr.msk.f32.mxu0 %vm2902_vm0, %v2901_v18  ;;  %2795 = vmatprep.subr.mxu0 %v2901_v18 }
 0x111   :  { %2814 = vmatprep.subr.mxu1 %v2901_v18 }
 0x11e   :  { %v1442_v48 = vpop.trf.xlu1 }
 0x11f   :  { %v1337_v49 = vpop.trf.xlu0  ;;  %2793 = vmatmul.mubr.msk.f32.vlgmr.msra.gmra.mxu1 %vm302_vm1, %v1442_v48 }
 0x120   :  { %2774 = vmatmul.mubr.msk.f32.vlgmr.msra.gmra.mxu0 %vm302_vm1, %v1337_v49  ;;  %2815 = vmatpush3.msra.mxu1 %v253_v47 }
 0x121   :  { %2796 = vmatpush3.msra.mxu0 %v245_v46  ;;  %2816 = vmatprep.subr.mxu1 %v2901_v18 }
 0x122   :  { %2797 = vmatprep.subr.mxu0 %v2901_v18  ;;  %2817 = vmatpush3.msra.mxu1 %v252_v51 }
 0x123   :  { %2798 = vmatpush3.msra.mxu0 %v244_v50  ;;  %2818 = vmatprep.subr.mxu1 %v2901_v18  ;;  %v2904_v50 = vmov 1934713408  }
 0x124   :  { %2799 = vmatprep.subr.mxu0 %v2901_v18  ;;  %2819 = vmatpush3.msra.mxu1 %v251_v53  ;;  %v2018_v51 = vunpack.c.l.s4 %v2904_v50 }
 0x125   :  { %2800 = vmatpush3.msra.mxu0 %v243_v52  ;;  %2820 = vmatprep.subr.mxu1 %v2901_v18 }
 0x126   :  { %2801 = vmatprep.subr.mxu0 %v2901_v18  ;;  %2821 = vmatpush3.msra.mxu1 %v250_v55  ;;  %v2019_v52 = vunpack.c.0.s8 %v2018_v51 }
 0x127   :  { %2802 = vmatpush3.msra.mxu0 %v242_v54  ;;  %2822 = vmatprep.subr.mxu1 %v2901_v18 }
 0x128   :  { %2803 = vmatprep.subr.mxu0 %v2901_v18  ;;  %2823 = vmatpush3.msra.mxu1 %v249_v57  ;;  %v3890_v55 = vsub.s32 %v2019_v52, %v1957_v27 }
 0x129   :  { %2804 = vmatpush3.msra.mxu0 %v241_v56  ;;  %2824 = vmatprep.subr.mxu1 %v2901_v18 }
 0x12a   :  { %2805 = vmatprep.subr.mxu0 %v2901_v18  ;;  %2825 = vmatpush3.msra.mxu1 %v248_v59 }
 0x12b   :  { %2806 = vmatpush3.msra.mxu0 %v240_v58  ;;  %2826 = vmatprep.subr.mxu1 %v2901_v18 }
 0x12c   :  { %2807 = vmatprep.subr.mxu0 %v2901_v18  ;;  %2827 = vmatpush3.msra.mxu1 %v247_v61 }
 0x12d   :  { %2808 = vmatpush3.msra.mxu0 %v239_v60  ;;  %2828 = vmatprep.subr.mxu1 %v2901_v18 }
 0x12e   :  { %2809 = vmatprep.subr.mxu0 %v2901_v18  ;;  %2829 = vmatpush3.msra.mxu1 %v246_v62 }
 0x12f   :  { %2830 = vmatprep.mubr.msk.f32.mxu1 %vm2902_vm0, %v2901_v18  ;;  %2810 = vmatpush3.msra.mxu0 %v238_v63 }
 0x130   :  { %2811 = vmatprep.mubr.msk.f32.mxu0 %vm2902_vm0, %v2901_v18  ;;  %2833 = vmatprep.subr.mxu0 %v2901_v18 }
 0x131   :  { %2852 = vmatprep.subr.mxu1 %v2901_v18 }
 0x13e   :  { %v1652_v2 = vpop.trf.xlu1 }
 0x13f   :  { %v1547_v3 = vpop.trf.xlu0  ;;  %2831 = vmatmul.mubr.msk.f32.vlgmr.msra.gmra.mxu1 %vm302_vm1, %v1652_v2  ;;  %v3822_v7 = vpop.f32.mrf.mxu1 }
 0x140   :  { %2812 = vmatmul.mubr.msk.f32.vlgmr.msra.gmra.mxu0 %vm302_vm1, %v1547_v3  ;;  %v3820_v6 = vpop.f32.mrf.mxu0  ;;  %2853 = vmatpush3.msra.mxu1 %v269_v1 }
 0x141   :  { %2834 = vmatpush3.msra.mxu0 %v261_v0  ;;  %2854 = vmatprep.subr.mxu1 %v2901_v18  ;;  %v2604_v11 = vpop.f32.mrf.mxu1 }
 0x142   :  { %2835 = vmatprep.subr.mxu0 %v2901_v18  ;;  %v2585_v10 = vpop.f32.mrf.mxu0  ;;  %2855 = vmatpush3.msra.mxu1 %v268_v5 }
 0x143   :  { %2836 = vmatpush3.msra.mxu0 %v260_v4  ;;  %2856 = vmatprep.subr.mxu1 %v2901_v18 }
 0x144   :  { %2837 = vmatprep.subr.mxu0 %v2901_v18  ;;  %2857 = vmatpush3.msra.mxu1 %v267_v9 }
 0x145   :  { %2838 = vmatpush3.msra.mxu0 %v259_v8  ;;  %2858 = vmatprep.subr.mxu1 %v2901_v18 }
 0x146   :  { %2839 = vmatprep.subr.mxu0 %v2901_v18  ;;  %2859 = vmatpush3.msra.mxu1 %v266_v13 }
 0x147   :  { %2840 = vmatpush3.msra.mxu0 %v258_v12  ;;  %2860 = vmatprep.subr.mxu1 %v2901_v18 }
 0x148   :  { %2841 = vmatprep.subr.mxu0 %v2901_v18  ;;  %2861 = vmatpush3.msra.mxu1 %v265_v15 }
 0x149   :  { %2842 = vmatpush3.msra.mxu0 %v257_v14  ;;  %2862 = vmatprep.subr.mxu1 %v2901_v18 }
 0x14a   :  { %2843 = vmatprep.subr.mxu0 %v2901_v18  ;;  %2863 = vmatpush3.msra.mxu1 %v264_v17 }
 0x14b   :  { %2844 = vmatpush3.msra.mxu0 %v256_v16  ;;  %2864 = vmatprep.subr.mxu1 %v2901_v18 }
 0x14c   :  { %2845 = vmatprep.subr.mxu0 %v2901_v18  ;;  %2865 = vmatpush3.msra.mxu1 %v263_v20 }
 0x14d   :  { %2846 = vmatpush3.msra.mxu0 %v255_v19  ;;  %2866 = vmatprep.subr.mxu1 %v2901_v18 }
 0x14e   :  { %2847 = vmatprep.subr.mxu0 %v2901_v18  ;;  %2867 = vmatpush3.msra.mxu1 %v262_v21 }
 0x14f   :  { %2868 = vmatprep.mubr.msk.f32.mxu1 %vm2902_vm0, %v2901_v18  ;;  %2848 = vmatpush3.msra.mxu0 %v254_v22 }
 0x150   :  { %2849 = vmatprep.mubr.msk.f32.mxu0 %vm2902_vm0, %v2901_v18 }
 0x15e   :  { %v1862_v28 = vpop.trf.xlu1 }
 0x15f   :  { %v1757_v29 = vpop.trf.xlu0  ;;  %2869 = vmatmul.mubr.msk.f32.vlgmr.msra.gmra.mxu1 %vm302_vm1, %v1862_v28  ;;  %v687_v32 = vpop.f32.mrf.mxu1 }
 0x160   :  { %2850 = vmatmul.mubr.msk.f32.vlgmr.msra.gmra.mxu0 %vm302_vm1, %v1757_v29  ;;  %v582_v31 = vpop.f32.mrf.mxu0  ;;  %v1967_v18 = vcombine.low %v3822_v7, %v687_v32  ;;  %v1968_v35 = vcombine.high %v3822_v7, %v687_v32 }
 0x161   :  { %v1951_v33 = vcombine.low %v3820_v6, %v582_v31  ;;  %v1952_v34 = vcombine.high %v3820_v6, %v582_v31  ;;  %v2642_v37 = vpop.f32.mrf.mxu1 }
 0x162   :  { %v2623_v36 = vpop.f32.mrf.mxu0  ;;  %v1975_v40 = vrot.slane %v1967_v18, %v3878_v30  ;;  %v1982_v41 = vrot.slane %v1968_v35, %v3878_v30 }
 0x163   :  { %v1959_v38 = vrot.slane %v1951_v33, %v3878_v30  ;;  %v1966_v39 = vrot.slane %v1952_v34, %v3878_v30 }
 0x165   :  { %v2015_v42 = vcombine.low %v1959_v38, %v1975_v40  ;;  %v2016_v43 = vcombine.high %v1959_v38, %v1975_v40  ;;  %v2031_v44 = vcombine.low %v1966_v39, %v1982_v41  ;;  %v2032_v45 = vcombine.high %v1966_v39, %v1982_v41 }
 0x167   :  { %v2030_v2 = vrot.slane %v2016_v43, %v3890_v55  ;;  %v3898_v6 = vrot.slane %v2015_v42, %v3890_v55  ;;  %v3901_v7 = vrot.slane %v2032_v45, %v3890_v55  ;;  %v2039_v17 = vrot.slane %v2031_v44, %v3890_v55 }
 0x17f   :  { %v897_v47 = vpop.f32.mrf.mxu1 }
 0x180   :  { %v792_v46 = vpop.f32.mrf.mxu0 }
 0x181   :  { %v2680_v49 = vpop.f32.mrf.mxu1 }
 0x182   :  { %v2661_v48 = vpop.f32.mrf.mxu0 }
 0x183   :  { %v2306_v48 = vld [vmem:[%s4009_s2 + $0x30] sm:$0xff] }
 0x19f   :  { %v1107_v54 = vpop.f32.mrf.mxu1 }
 0x1a0   :  { %v1002_v53 = vpop.f32.mrf.mxu0  ;;  %v1999_v58 = vcombine.low %v897_v47, %v1107_v54  ;;  %v2000_v59 = vcombine.high %v897_v47, %v1107_v54  ;;  %v2307_v47 = vld [vmem:[%s4009_s2 + $0x38] sm:$0xff] }
 0x1a1   :  { %v1983_v56 = vcombine.low %v792_v46, %v1002_v53  ;;  %v1984_v57 = vcombine.high %v792_v46, %v1002_v53  ;;  %v2718_v61 = vpop.f32.mrf.mxu1  ;;  %2871 = vmatprep.subr.mxu0 %v2307_v47 }
 0x1a2   :  { %v2699_v60 = vpop.f32.mrf.mxu0  ;;  %v2007_v0 = vrot.slane %v1999_v58, %v3878_v30  ;;  %v2014_v1 = vrot.slane %v2000_v59, %v3878_v30  ;;  %2872 = vmatpush3.msra.mxu0 %v2307_v47 }
 0x1a3   :  { %v1991_v62 = vrot.slane %v1983_v56, %v3878_v30  ;;  %v1998_v63 = vrot.slane %v1984_v57, %v3878_v30  ;;  %2873 = vmatprep.subr.mxu0 %v2306_v48 }
 0x1a4   :  { %2874 = vmatpush3.msra.mxu0 %v2306_v48 }
 0x1a5   :  { %v2047_v3 = vcombine.low %v1991_v62, %v2007_v0  ;;  %v2048_v4 = vcombine.high %v1991_v62, %v2007_v0  ;;  %v2064_v5 = vcombine.high %v1998_v63, %v2014_v1  ;;  %v2063_v8 = vcombine.low %v1998_v63, %v2014_v1  ;;  %v2305_v62 = vld [vmem:[%s4009_s2 + $0x28] sm:$0xff]  ;;  %v2304_v63 = vld [vmem:[%s4009_s2 + $0x20] sm:$0xff] }
 0x1a6   :  { %2875 = vmatprep.subr.mxu0 %v2305_v62 }
 0x1a7   :  { %v2062_v9 = vrot.slane %v2048_v4, %v3890_v55  ;;  %v3905_v10 = vrot.slane %v2047_v3, %v3890_v55  ;;  %v3908_v11 = vrot.slane %v2064_v5, %v3890_v55  ;;  %v2071_v19 = vrot.slane %v2063_v8, %v3890_v55  ;;  %2876 = vmatpush3.msra.mxu0 %v2305_v62  ;;  %v2303_v3 = vld [vmem:[%s4009_s2 + $0x18] sm:$0xff] }
 0x1a8   :  { %2877 = vmatprep.subr.mxu0 %v2304_v63 }
 0x1a9   :  { %v2081_v12 = vcombine.low %v2030_v2, %v2062_v9  ;;  %v2080_v13 = vcombine.high %v3898_v6, %v3905_v10  ;;  %v2079_v14 = vcombine.low %v3898_v6, %v3905_v10  ;;  %v2086_v15 = vcombine.high %v3901_v7, %v3908_v11  ;;  %2878 = vmatpush3.msra.mxu0 %v2304_v63 }
 0x1aa   :  { %v2082_v16 = vcombine.high %v2030_v2, %v2062_v9  ;;  %v2083_v20 = vcombine.low %v2039_v17, %v2071_v19  ;;  %v2084_v21 = vcombine.high %v2039_v17, %v2071_v19  ;;  %v2085_v22 = vcombine.low %v3901_v7, %v3908_v11  ;;  %2879 = vmatprep.subr.mxu0 %v2303_v3 }
 0x1ab   :  { %2233 = vrot.lane.b32.xlu1 %v2081_v12, %s2905_s1  ;;  %2225 = vrot.lane.b32.xlu0 %v2080_v13, %s2906_s7 }
 0x1ac   :  { %2880 = vmatpush3.msra.mxu0 %v2303_v3 }
 0x1af   :  { %2241 = vrot.lane.b32.xlu1 %v2082_v16, %s2907_s8  ;;  %v2302_v16 = vld [vmem:[%s4009_s2 + $0x10] sm:$0xff] }
 0x1b0   :  { %2881 = vmatprep.subr.mxu0 %v2302_v16 }
 0x1b1   :  { %2882 = vmatpush3.msra.mxu0 %v2302_v16 }
 0x1b3   :  { %2249 = vrot.lane.b32.xlu1 %v2083_v20, %s2908_s9  ;;  %v2301_v20 = vld [vmem:[%s4009_s2 + $0x8] sm:$0xff] }
 0x1b4   :  { %2883 = vmatprep.subr.mxu0 %v2301_v20 }
 0x1b5   :  { %2884 = vmatpush3.msra.mxu0 %v2301_v20 }
 0x1b7   :  { %2257 = vrot.lane.b32.xlu1 %v2084_v21, %s2909_s10 }
 0x1bb   :  { %2265 = vrot.lane.b32.xlu1 %v2085_v22, %s2910_s11 }
 0x1bf   :  { %v1317_v24 = vpop.f32.mrf.mxu1 }
 0x1c0   :  { %v1212_v23 = vpop.f32.mrf.mxu0 }
 0x1c1   :  { %v2756_v26 = vpop.f32.mrf.mxu1 }
 0x1c2   :  { %v2737_v25 = vpop.f32.mrf.mxu0 }
 0x1df   :  { %v1527_v28 = vpop.f32.mrf.mxu1 }
 0x1e0   :  { %v1422_v27 = vpop.f32.mrf.mxu0  ;;  %v2103_v32 = vcombine.low %v1317_v24, %v1527_v28  ;;  %v2104_v33 = vcombine.high %v1317_v24, %v1527_v28  ;;  %v2300_v24 = vld [vmem:[%s4009_s2] sm:$0xff] }
 0x1e1   :  { %v2087_v29 = vcombine.low %v1212_v23, %v1422_v27  ;;  %v2088_v31 = vcombine.high %v1212_v23, %v1422_v27  ;;  %v2794_v18 = vpop.f32.mrf.mxu1  ;;  %2885 = vmatprep.subr.mxu0 %v2300_v24 }
 0x1e2   :  { %v2775_v34 = vpop.f32.mrf.mxu0  ;;  %v2111_v37 = vrot.slane %v2103_v32, %v3878_v30  ;;  %v3932_v38 = vrot.slane %v2104_v33, %v3878_v30  ;;  %2886 = vmatpush3.msra.mxu0 %v2300_v24 }
 0x1e3   :  { %v2095_v35 = vrot.slane %v2087_v29, %v3878_v30  ;;  %v3928_v36 = vrot.slane %v2088_v31, %v3878_v30 }
 0x1e5   :  { %v2151_v39 = vcombine.low %v2095_v35, %v2111_v37  ;;  %v2152_v40 = vcombine.high %v2095_v35, %v2111_v37  ;;  %v2167_v41 = vcombine.low %v3928_v36, %v3932_v38  ;;  %v2168_v42 = vcombine.high %v3928_v36, %v3932_v38 }
 0x1e7   :  { %v2159_v5 = vrot.slane %v2151_v39, %v3890_v55  ;;  %v2175_v17 = vrot.slane %v2167_v41, %v3890_v55  ;;  %v2182_v27 = vrot.slane %v2168_v42, %v3890_v55 }
 0x1ff   :  { %v1737_v44 = vpop.f32.mrf.mxu1 }
 0x200   :  { %v1632_v43 = vpop.f32.mrf.mxu0 }
 0x201   :  { %v2832_v46 = vpop.f32.mrf.mxu1 }
 0x202   :  { %v2813_v45 = vpop.f32.mrf.mxu0 }
 0x21d   :  { %v2234_v31 = vpop.permute.xlu1 %2233  ;;  %v2226_v18 = vpop.permute.xlu0 %2225 }
 0x21e   :  { %v2280_v11 = vsel %vm2279_vm2, %v2079_v14, %v2226_v18 }
 0x21f   :  { %v1947_v50 = vpop.f32.mrf.mxu1 }
 0x220   :  { %v1842_v49 = vpop.f32.mrf.mxu0  ;;  %v2135_v53 = vcombine.low %v1737_v44, %v1947_v50  ;;  %v2136_v54 = vcombine.high %v1737_v44, %v1947_v50 }
 0x221   :  { %v2119_v51 = vcombine.low %v1632_v43, %v1842_v49  ;;  %v2120_v52 = vcombine.high %v1632_v43, %v1842_v49  ;;  %v2870_v57 = vpop.f32.mrf.mxu1  ;;  %v2242_v32 = vpop.permute.xlu1 %2241 }
 0x222   :  { %v2851_v56 = vpop.f32.mrf.mxu0  ;;  %v2143_v60 = vrot.slane %v2135_v53, %v3878_v30  ;;  %v2150_v61 = vrot.slane %v2136_v54, %v3878_v30 }
 0x223   :  { %v2127_v58 = vrot.slane %v2119_v51, %v3878_v30  ;;  %v2134_v59 = vrot.slane %v2120_v52, %v3878_v30  ;;  %v2166_v30 = vrot.slane %v2152_v40, %v3890_v55 }
 0x225   :  { %v2183_v0 = vcombine.low %v2127_v58, %v2143_v60  ;;  %v2184_v1 = vcombine.high %v2127_v58, %v2143_v60  ;;  %v2199_v2 = vcombine.low %v2134_v59, %v2150_v61  ;;  %v2200_v21 = vcombine.high %v2134_v59, %v2150_v61  ;;  %v2250_v33 = vpop.permute.xlu1 %2249 }
 0x227   :  { %v2198_v4 = vrot.slane %v2184_v1, %v3890_v55  ;;  %v2191_v8 = vrot.slane %v2183_v0, %v3890_v55  ;;  %v2207_v13 = vrot.slane %v2199_v2, %v3890_v55  ;;  %v2214_v26 = vrot.slane %v2200_v21, %v3890_v55 }
 0x228   :  { %v2283_v55 = vsel %vm2282_vm3, %v2280_v11, %v2234_v31 }
 0x229   :  { %v2218_v9 = vcombine.high %v2166_v30, %v2198_v4  ;;  %v2216_v12 = vcombine.high %v2159_v5, %v2191_v8  ;;  %v2215_v19 = vcombine.low %v2159_v5, %v2191_v8  ;;  %v2219_v22 = vcombine.low %v2175_v17, %v2207_v13  ;;  %v2258_v34 = vpop.permute.xlu1 %2257 }
 0x22a   :  { %v2217_v23 = vcombine.low %v2166_v30, %v2198_v4  ;;  %v2220_v25 = vcombine.high %v2175_v17, %v2207_v13  ;;  %v2221_v28 = vcombine.low %v2182_v27, %v2214_v26  ;;  %v2222_v29 = vcombine.high %v2182_v27, %v2214_v26 }
 0x22b   :  { %2243 = vrot.lane.b32.xlu0 %v2218_v9, %s2907_s8  ;;  %2227 = vrot.lane.b32.xlu1 %v2216_v12, %s2906_s7  ;;  %v2286_v38 = vsel %vm2285_vm4, %v2283_v55, %v2242_v32 }
 0x22c   :  { %v2289_v40 = vsel %vm2288_vm5, %v2286_v38, %v2250_v33 }
 0x22d   :  { %v2266_v35 = vpop.permute.xlu1 %2265  ;;  %v2292_v6 = vsel %vm2291_vm6, %v2289_v40, %v2258_v34 }
 0x22e   :  { %v2295_v10 = vsel %vm2294_vm7, %v2292_v6, %v2266_v35 }
 0x22f   :  { %2251 = vrot.lane.b32.xlu0 %v2219_v22, %s2908_s9  ;;  %2235 = vrot.lane.b32.xlu1 %v2217_v23, %s2905_s1 }
 0x233   :  { %2259 = vrot.lane.b32.xlu0 %v2220_v25, %s2909_s10  ;;  %2273 = vrot.lane.b32.xlu1 %v2086_v15, %s2911_s28 }
 0x237   :  { %2267 = vrot.lane.b32.xlu0 %v2221_v28, %s2910_s11 }
 0x23b   :  { %2275 = vrot.lane.b32.xlu0 %v2222_v29, %s2911_s28 }
 0x29d   :  { %v2228_v37 = vpop.permute.xlu1 %2227  ;;  %v2244_v7 = vpop.permute.xlu0 %2243 }
 0x29e   :  { %v2281_v39 = vsel %vm2279_vm2, %v2215_v19, %v2228_v37 }
 0x2a1   :  { %v2236_v15 = vpop.permute.xlu1 %2235  ;;  %v2252_v36 = vpop.permute.xlu0 %2251 }
 0x2a2   :  { %v2284_v41 = vsel %vm2282_vm3, %v2281_v39, %v2236_v15 }
 0x2a3   :  { %v2287_v43 = vsel %vm2285_vm4, %v2284_v41, %v2244_v7 }
 0x2a4   :  { %v2290_v45 = vsel %vm2288_vm5, %v2287_v43, %v2252_v36 }
 0x2a5   :  { %v2274_v14 = vpop.permute.xlu1 %2273  ;;  %v2260_v42 = vpop.permute.xlu0 %2259 }
 0x2a6   :  { %v2298_v44 = vsel %vm2297_vm8, %v2295_v10, %v2274_v14  ;;  %v2293_v47 = vsel %vm2291_vm6, %v2290_v45, %v2260_v42 }
 0x2a7   :  { %2887 = vmatprep.mubr.msk.f32.mxu0 %vm302_vm1, %v2298_v44 }
 0x2a9   :  { %v2268_v46 = vpop.permute.xlu0 %2267 }
 0x2aa   :  { %v2296_v48 = vsel %vm2294_vm7, %v2293_v47, %v2268_v46 }
 0x2ad   :  { %v2276_v49 = vpop.permute.xlu0 %2275 }
 0x2ae   :  { %v2299_v50 = vsel %vm2297_vm8, %v2296_v48, %v2276_v49 }
 0x2af   :  { %2888 = vmatmul.mubr.msk.f32.vlgmr.msra.gmra.mxu0 %vm302_vm1, %v2299_v50 }
 0x36f   :  { %v2889_v51 = vpop.f32.mrf.mxu0 }
 0x370   :  { %2390 = vst.msk [vmem:[%s4010_s3 + $0x8] sm:$0xff] %vm2279_vm2, %v2889_v51 }
 0x371   :  { %v2380_v52 = vpop.f32.mrf.mxu0 }
 0x372   :  { %2389 = vst.msk [vmem:[%s4010_s3] sm:$0xff] %vm2279_vm2, %v2380_v52 }

</bundles_post_ra>
